<compile_context>
chip_gen: v5e
topology: v5e:2x2
jax: 0.10.0
libtpu: 0.0.40
codegen_flags: <defaults>
</compile_context>

<pallas_src>
import functools

import jax
import jax.numpy as jnp
from jax.experimental import pallas as pl
from jax.experimental.pallas import tpu as pltpu


# ----------------------------------------------------------------------------
# Kernel
# ----------------------------------------------------------------------------
def _fused_rpn_kernel(x_ref, w_ref, b_ref, cls_ref, bbox_ref):
    # x_ref:    (C, THW)    activation tile (NCHW, spatial flattened, N squeezed)
    # w_ref:    (5A, C)     concatenated [cls_logits; bbox_pred] weights
    # b_ref:    (5A, 1)     concatenated biases
    # cls_ref:  (A, THW)    cls output tile
    # bbox_ref: (4A, THW)   bbox output tile
    A = cls_ref.shape[0]
    x = x_ref[...]                                   # loaded once, feeds both heads
    y = jnp.dot(w_ref[...], x, preferred_element_type=jnp.float32) + b_ref[...]
    cls_ref[...] = y[:A].astype(cls_ref.dtype)       # row-3 slice -> XLU (has slack)
    bbox_ref[...] = y[A:].astype(bbox_ref.dtype)


# ----------------------------------------------------------------------------
# Chip-aware tiling helpers (evaluated in Python, outside jit)
# ----------------------------------------------------------------------------
def _round_up_128(x):
    return (int(x) + 127) // 128 * 128


def _chip_tile_params():
    """Return (max spatial lanes per tile, scoped-VMEM footprint budget bytes)."""
    kind = ""
    try:
        kind = jax.devices()[0].device_kind.lower()
    except Exception:
        pass
    try:
        phys_vmem = int(pltpu.get_tpu_info().vmem_capacity_bytes)
    except Exception:
        phys_vmem = 64 << 20  # most conservative (v7x per-TC)
    # v5e: ~0.82 TB/s HBM -> 2048 lanes already amortizes per-step overhead.
    # v6e/v7x: faster HBM -> go bigger (4096), still tiny vs VMEM.
    cap = 2048 if "v5" in kind else 4096
    budget = min(phys_vmem // 3, 20 << 20)
    return cap, budget


def _pick_thw(HW, C, A, itemsize, N):
    """Choose a lane-dense spatial tile (multiple of 128) for one feature map."""
    cap, budget = _chip_tile_params()
    thw = 128
    for cand in (4096, 2048, 1024, 512, 256, 128):
        if cand > cap:
            continue
        # double-buffered input + (cls + bbox) output tiles
        footprint = 2 * (C + 5 * A) * cand * itemsize
        if footprint <= budget:
            thw = cand
            break
    # Whole map when it is smaller than the tile (full-dim block is legal).
    if HW <= thw:
        thw = HW
    # Guarantee >= 2 grid steps so v7x's two TensorCores both get work.
    if N * pl.cdiv(HW, thw) < 2 and HW >= 256:
        thw = max(128, _round_up_128(pl.cdiv(HW, 2)))
    return int(thw)


# ----------------------------------------------------------------------------
# Pallas path (one feature map)
# ----------------------------------------------------------------------------
@functools.partial(jax.jit, static_argnames=("thw",))
def _rpn_head_pallas(x_nchw, w_cat, b_cat, thw):
    N, C, H, W = x_nchw.shape
    HW = H * W
    A5 = w_cat.shape[0]
    A = A5 // 5
    K4 = 4 * A

    x3 = x_nchw.reshape(N, C, HW)  # NCHW kept as-is, no transpose
    itemsize = jnp.dtype(x_nchw.dtype).itemsize

    grid = (N, pl.cdiv(HW, thw))

    flops = 2 * N * HW * C * A5
    bytes_accessed = int(
        itemsize * (x3.size + N * HW * A5) + 4 * (w_cat.size + b_cat.size)
    )

    # Explicit scoped-VMEM limit: double-buffered input/output tiles + weights,
    # with headroom for internal scratch. Stays well under v7x's 64 MiB physical.
    footprint = 2 * (C + A5) * thw * itemsize + 2 * (A5 * C + A5) * 4
    vmem_limit = int(min(max(2 * footprint, 16 << 20) + (4 << 20), 48 << 20))

    cls_out, bbox_out = pl.pallas_call(
        _fused_rpn_kernel,
        out_shape=(
            jax.ShapeDtypeStruct((N, A, HW), x_nchw.dtype),
            jax.ShapeDtypeStruct((N, K4, HW), x_nchw.dtype),
        ),
        grid_spec=pltpu.PrefetchScalarGridSpec(
            num_scalar_prefetch=0,
            grid=grid,
            in_specs=[
                # Leading N dim squeezed (None) -> kernel sees clean 2-D tiles.
                pl.BlockSpec((None, C, thw), lambda n, j: (n, 0, j)),
                pl.BlockSpec((A5, C), lambda n, j: (0, 0)),
                pl.BlockSpec((A5, 1), lambda n, j: (0, 0)),
            ],
            out_specs=(
                pl.BlockSpec((None, A, thw), lambda n, j: (n, 0, j)),
                pl.BlockSpec((None, K4, thw), lambda n, j: (n, 0, j)),
            ),
        ),
        compiler_params=pltpu.CompilerParams(
            # Both axes independent -> shardable across v7x's two TensorCores.
            dimension_semantics=("parallel", "parallel"),
            vmem_limit_bytes=vmem_limit,
        ),
        cost_estimate=pl.CostEstimate(
            flops=flops, transcendentals=0, bytes_accessed=bytes_accessed
        ),
    )(x3, w_cat, b_cat)

    return cls_out.reshape(N, A, H, W), bbox_out.reshape(N, K4, H, W)


# ----------------------------------------------------------------------------
# XLA fallback for tiny pyramid levels (HW < 128 lanes)
# ----------------------------------------------------------------------------
@jax.jit
def _rpn_head_xla(x_nchw, w_cat, b_cat):
    A5 = w_cat.shape[0]
    A = A5 // 5
    y = jnp.einsum("nchw,kc->nkhw", x_nchw, w_cat) + b_cat.reshape(1, A5, 1, 1)
    y = y.astype(x_nchw.dtype)
    return y[:, :A], y[:, A:]


# ----------------------------------------------------------------------------
# Module-level API
# ----------------------------------------------------------------------------
def init_params(key, in_channels, num_anchors):
    """Deterministic init mirroring the PyTorch module: normal(std=0.01), zero bias."""
    k1, k2 = jax.random.split(key)
    cls_w = 0.01 * jax.random.normal(
        k1, (num_anchors, in_channels, 1, 1), dtype=jnp.float32
    )
    cls_b = jnp.zeros((num_anchors,), dtype=jnp.float32)
    bbox_w = 0.01 * jax.random.normal(
        k2, (num_anchors * 4, in_channels, 1, 1), dtype=jnp.float32
    )
    bbox_b = jnp.zeros((num_anchors * 4,), dtype=jnp.float32)
    return {
        "cls_logits": {"weight": cls_w, "bias": cls_b},
        "bbox_pred": {"weight": bbox_w, "bias": bbox_b},
    }


def rpn_head_conv_regressor(params, xs):
    """Forward pass: xs is a list/tuple of NCHW feature maps."""
    assert isinstance(xs, (list, tuple))
    wc = params["cls_logits"]["weight"]
    bc = params["cls_logits"]["bias"]
    wb = params["bbox_pred"]["weight"]
    bb = params["bbox_pred"]["bias"]
    A, C = wc.shape[0], wc.shape[1]

    # Fuse the two heads into one (5A, C) weight / (5A, 1) bias operand.
    w_cat = jnp.concatenate([wc.reshape(A, C), wb.reshape(4 * A, C)], axis=0)
    b_cat = jnp.concatenate([bc, bb], axis=0).reshape(5 * A, 1)

    logits, bbox_reg = [], []
    for y in xs:
        N, Cy, H, W = y.shape
        HW = H * W
        if HW < 128:
            # Sub-128-lane maps: Pallas launch + pipeline-fill overhead dominates
            # and the output cannot be lane-dense; let XLA handle it.
            cls, bbox = _rpn_head_xla(y, w_cat, b_cat)
        else:
            thw = _pick_thw(HW, Cy, A, jnp.dtype(y.dtype).itemsize, N)
            cls, bbox = _rpn_head_pallas(y, w_cat, b_cat, thw=thw)
        logits.append(cls)
        bbox_reg.append(bbox)
    return logits, bbox_reg


def _reference_forward(params, xs):
    """Plain-JAX reference (1x1 conv == channel matmul) for validation."""

    def conv(y, w, b):
        O = w.shape[0]
        wm = w.reshape(O, -1)
        return jnp.einsum("nchw,oc->nohw", y, wm) + b.reshape(1, O, 1, 1)

    logits = [
        conv(y, params["cls_logits"]["weight"], params["cls_logits"]["bias"])
        for y in xs
    ]
    bbox = [
        conv(y, params["bbox_pred"]["weight"], params["bbox_pred"]["bias"])
        for y in xs
    ]
    return logits, bbox


if __name__ == "__main__":
    key = jax.random.PRNGKey(0)
    k_params, k_x1, k_x2 = jax.random.split(key, 3)

    in_channels = 16
    num_anchors = 3

    params = init_params(k_params, in_channels, num_anchors)

    # Two feature levels (the module expects a list of feature maps), NCHW.
    x1 = jax.random.normal(k_x1, (2, in_channels, 16, 16), dtype=jnp.float32)  # Pallas path
    x2 = jax.random.normal(k_x2, (2, in_channels, 8, 8), dtype=jnp.float32)    # XLA fallback
    xs = [x1, x2]

    logits, bbox_reg = rpn_head_conv_regressor(params, xs)
    jax.block_until_ready(logits)
    jax.block_until_ready(bbox_reg)

    # Sanity check against plain-JAX reference.
    ref_logits, ref_bbox = _reference_forward(params, xs)
    for got, ref in zip(logits + bbox_reg, ref_logits + ref_bbox):
        assert got.shape == ref.shape
        assert jnp.allclose(got, ref, atol=1e-4, rtol=1e-4)

    print("KERNEL_OK")
</pallas_src>

<mosaic_0001>
module attributes {stable_mosaic.version = 11 : i64} {
  func.func @_fused_rpn_kernel(%arg0: i32, %arg1: i32, %arg2: memref<1x16x256xf32, #tpu.memory_space<vmem>>, %arg3: memref<15x16xf32, #tpu.memory_space<vmem>>, %arg4: memref<15x1xf32, #tpu.memory_space<vmem>>, %arg5: memref<1x3x256xf32, #tpu.memory_space<vmem>>, %arg6: memref<1x12x256xf32, #tpu.memory_space<vmem>>) attributes {dimension_semantics = [#tpu.dimension_semantics<parallel>, #tpu.dimension_semantics<parallel>], iteration_bounds = array<i64: 2, 1>, scalar_prefetch = 0 : i64, scratch_operands = 0 : i64, tpu.core_type = #tpu.core_type<tc>, window_params = [{transform_indices = @transform_0, window_bounds = array<i64: 1, 16, 256>}, {pipeline_mode = #tpu.pipeline_mode<synchronous>, transform_indices = @transform_1, window_bounds = array<i64: 15, 16>}, {pipeline_mode = #tpu.pipeline_mode<synchronous>, transform_indices = @transform_2, window_bounds = array<i64: 15, 1>}, {transform_indices = @transform_3, window_bounds = array<i64: 1, 3, 256>}, {transform_indices = @transform_4, window_bounds = array<i64: 1, 12, 256>}]} {
    %c0 = arith.constant 0 : index
    %c0_0 = arith.constant 0 : index
    %c0_1 = arith.constant 0 : index
    %0 = vector.load %arg2[%c0, %c0_0, %c0_1] : memref<1x16x256xf32, #tpu.memory_space<vmem>>, vector<1x16x256xf32>
    %1 = vector.shape_cast %0 : vector<1x16x256xf32> to vector<16x256xf32>
    %c0_2 = arith.constant 0 : index
    %c0_3 = arith.constant 0 : index
    %2 = vector.load %arg3[%c0_2, %c0_3] : memref<15x16xf32, #tpu.memory_space<vmem>>, vector<15x16xf32>
    %cst = arith.constant dense<0.000000e+00> : vector<15x256xf32>
    %3 = tpu.matmul %2, %1, %cst {dimension_numbers = #tpu.dot_dimension_numbers<[1], [0], [0], [1], [0, 0, 1, 1], [], []>} : vector<15x16xf32>, vector<16x256xf32>, vector<15x256xf32> -> vector<15x256xf32>
    %c0_4 = arith.constant 0 : index
    %c0_5 = arith.constant 0 : index
    %4 = vector.load %arg4[%c0_4, %c0_5] : memref<15x1xf32, #tpu.memory_space<vmem>>, vector<15x1xf32>
    %5 = vector.broadcast %4 : vector<15x1xf32> to vector<15x256xf32>
    %6 = arith.addf %3, %5 : vector<15x256xf32>
    %7 = vector.extract_strided_slice %6 {offsets = [0, 0], sizes = [3, 256], strides = [1, 1]} : vector<15x256xf32> to vector<3x256xf32>
    %c0_6 = arith.constant 0 : index
    %c0_7 = arith.constant 0 : index
    %c0_8 = arith.constant 0 : index
    %8 = vector.load %arg5[%c0_6, %c0_7, %c0_8] : memref<1x3x256xf32, #tpu.memory_space<vmem>>, vector<1x3x256xf32>
    %9 = vector.shape_cast %8 : vector<1x3x256xf32> to vector<3x256xf32>
    %10 = vector.shape_cast %7 : vector<3x256xf32> to vector<1x3x256xf32>
    tpu.vector_store %arg5[%c0_6, %c0_7, %c0_8], %10 {strides = array<i32>} : memref<1x3x256xf32, #tpu.memory_space<vmem>>, vector<1x3x256xf32>,
    %11 = vector.extract_strided_slice %6 {offsets = [3, 0], sizes = [12, 256], strides = [1, 1]} : vector<15x256xf32> to vector<12x256xf32>
    %c0_9 = arith.constant 0 : index
    %c0_10 = arith.constant 0 : index
    %c0_11 = arith.constant 0 : index
    %12 = vector.load %arg6[%c0_9, %c0_10, %c0_11] : memref<1x12x256xf32, #tpu.memory_space<vmem>>, vector<1x12x256xf32>
    %13 = vector.shape_cast %12 : vector<1x12x256xf32> to vector<12x256xf32>
    %14 = vector.shape_cast %11 : vector<12x256xf32> to vector<1x12x256xf32>
    tpu.vector_store %arg6[%c0_9, %c0_10, %c0_11], %14 {strides = array<i32>} : memref<1x12x256xf32, #tpu.memory_space<vmem>>, vector<1x12x256xf32>,
    return
  }
  func.func @transform_0(%arg0: i32, %arg1: i32) -> (i32, i32, i32) {
    %c0_i32 = arith.constant 0 : i32
    %c0_i32_0 = arith.constant 0 : i32
    return %arg0, %c0_i32, %arg1 : i32, i32, i32
  }
  func.func @transform_1(%arg0: i32, %arg1: i32) -> (i32, i32) {
    %c0_i32 = arith.constant 0 : i32
    %c0_i32_0 = arith.constant 0 : i32
    %c0_i32_1 = arith.constant 0 : i32
    return %c0_i32, %c0_i32_0 : i32, i32
  }
  func.func @transform_2(%arg0: i32, %arg1: i32) -> (i32, i32) {
    %c0_i32 = arith.constant 0 : i32
    %c0_i32_0 = arith.constant 0 : i32
    %c0_i32_1 = arith.constant 0 : i32
    return %c0_i32, %c0_i32_0 : i32, i32
  }
  func.func @transform_3(%arg0: i32, %arg1: i32) -> (i32, i32, i32) {
    %c0_i32 = arith.constant 0 : i32
    %c0_i32_0 = arith.constant 0 : i32
    return %arg0, %c0_i32, %arg1 : i32, i32, i32
  }
  func.func @transform_4(%arg0: i32, %arg1: i32) -> (i32, i32, i32) {
    %c0_i32 = arith.constant 0 : i32
    %c0_i32_0 = arith.constant 0 : i32
    return %arg0, %c0_i32, %arg1 : i32, i32, i32
  }
}

</mosaic_0001>

<bundles_post_ra>
// kernel: _rpn_head_pallas.1
= control target key start
LH: loop header
LB: loop body
LE: loop exit
PB: predicated region body
PF: predicated region fallthrough
CT: control target
= control target key end

     0   :  { %s593_s15 = smov 0   ;;  %s595_s16 = smov 0   ;;  %s649_s0 = inlined_call_operand.vmem [shape: f32[2,16,256], index: 0, kind: input, shape index: {}]   ;;  %s650_s1 = inlined_call_operand.vmem [shape: f32[15,16], index: 1, kind: input, shape index: {}]   ;;  %s651_s2 = inlined_call_operand.vmem [shape: f32[15,1], index: 2, kind: input, shape index: {}]   ;;  %s652_s3 = inlined_call_operand.vmem [shape: f32[2,3,256], index: 3, kind: output, shape index: {0}]   ;;  %s653_s4 = inlined_call_operand.vmem [shape: f32[2,12,256], index: 4, kind: output, shape index: {1}]  }
   0x1   :  { %s597_s17 = smov 0  }
   0x2 LB: > { %s27_s18 = sadd.s32 1, %s561_s16  ;;  %p497_p0 = scmp.ge.s32.totalorder %s565_s17, 1  ;;  %s565_s17 = sphi %s597_s17, %s15_s17   ;;  %s561_s16 = sphi %s595_s16, %s655_s16   ;;  %s557_s15 = sphi %s593_s15, %s654_s15  }
   0x3   : > { %p29_p1 = scmp.ge.s32.totalorder %s27_s18, 2  ;;  %p188_p2 = scmp.lt.s32.totalorder %s565_s17, 3 }
   0x5   : > { %s657_s18 = smov (%p29_p1, %s27_s18), 0  ;;  %p189_p3 = pnand %p497_p0, %p188_p2 }
   0x6   : > { %p232_p4 = scmp.lt.s32.totalorder (!%p189_p3), %s557_s15, 1 }
   0x7   : > { %192 = sbr.rel (%p189_p3) target bundleno = 160 (0xa0), region = 32 }
   0xc   : > { %v567_v0 = vmov 0   ;;  %v267_v1 = vld [vmem:[%s651_s2] sm:$0xff]  ;;  %s659_s15 = smov (!%p232_p4, %s557_s15), 1  ;;  %vm279_vm0 = vcmask 130048   ;;  %v266_v7 = vld [vmem:[%s650_s1 + $0x8] sm:$0x7f] }
   0xd   : > { %542 = vset.pattern.permute.xlu0 %v567_v0  ;;  %s510_s21 = sshll.u32 %s659_s15, 5  ;;  %v265_v6 = vld [vmem:[%s650_s1] sm:$0xff]  ;;  %v268_v8 = vld [vmem:[%s651_s2 + $0x8] sm:$0x7f]  ;;  %s511_s5 = sshll.u32 %s659_s15, 3  ;;  %vm335_vm1 = vcmask 1043456  }
   0xe   : > { %271 = vperm.xlu0 %542, %v267_v1   ;;  %s239_s24 = scalar_lea.vmem %s649_s0, %s510_s21  ;;  %s249_s8 = scalar_lea.vmem %s652_s3, %s511_s5  ;;  %vm341_vm2 = vcmask 1044480  }
   0xf   : > { %v263_v2 = vld [vmem:[%s239_s24 + $0x10] sm:$0xff]  ;;  %v264_v3 = vld [vmem:[%s239_s24 + $0x18] sm:$0xff]  ;;  %v261_v4 = vld [vmem:[%s239_s24] sm:$0xff]  ;;  %s259_s11 = scalar_lea.vmem %s653_s4, %s510_s21 }
  0x10   : > { %300 = vmatpush.msra.mxu0 %v263_v2  ;;  %513 = vmatpush.msra.mxu2 %v263_v2  ;;  %v262_v5 = vld [vmem:[%s239_s24 + $0x8] sm:$0xff] }
  0x11   : > { %323 = vmatpush.msra.mxu1 %v264_v3  ;;  %515 = vmatpush.msra.mxu3 %v264_v3 }
  0x12   : > { %301 = vmatpush.msra.mxu0 %v261_v4  ;;  %514 = vmatpush.msra.mxu2 %v261_v4 }
  0x13   : > { %324 = vmatpush.msra.mxu1 %v262_v5  ;;  %516 = vmatpush.msra.mxu3 %v262_v5 }
  0x14   : > { %504 = vmatmul.msk.f32.vlgmr.msra.gmra.mxu0 %vm279_vm0, %v265_v6  ;;  %505 = vmatmul.msk.f32.vlgmr.msra.gmra.mxu2 %vm279_vm0, %v266_v7 }
  0x15   : > { %506 = vmatmul.msk.f32.vlgmr.msra.gmra.mxu1 %vm279_vm0, %v265_v6  ;;  %507 = vmatmul.msk.f32.vlgmr.msra.gmra.mxu3 %vm279_vm0, %v266_v7 }
  0x16   : > { %276 = vperm.xlu0 %542, %v268_v8  }
  0x80   : > { %v272_v9 = vpop.permute.xlu0 %271 }
  0x88   : > { %v277_v15 = vpop.permute.xlu0 %276 }
  0x91   : > { %v303_v10 = vpop.f32.mrf.mxu0 }
  0x92   : > { %v326_v11 = vpop.f32.mrf.mxu1  ;;  %v304_v13 = vadd.f32 %v303_v10, %v272_v9 }
  0x93   : > { %v327_v12 = vadd.f32 %v326_v11, %v272_v9 }
  0x94   : > { %v342_v21 = vrot.slane %v304_v13, 3 }
  0x95   : > { %v334_v14 = vrot.slane %v327_v12, 4  ;;  %v345_v23 = vrot.slane %v327_v12, 3 }
  0x97   : > { %v336_v16 = vsel %vm335_vm1, %v304_v13, %v334_v14  ;;  %v306_v17 = vpop.f32.mrf.mxu2 }
  0x98   : > { %338 = vst [vmem:[%s249_s8] sm:$0x77] %v336_v16  ;;  %v307_v18 = vadd.f32 %v306_v17, %v277_v15  ;;  %v329_v19 = vpop.f32.mrf.mxu3 }
  0x99   : > { %v330_v20 = vadd.f32 %v329_v19, %v277_v15 }
  0x9a   : > { %v343_v22 = vrot.slane %v307_v18, 3 }
  0x9b   : > { %v346_v24 = vrot.slane %v330_v20, 3 }
  0x9c   : > { %v344_v25 = vsel %vm341_vm2, %v342_v21, %v343_v22  ;;  %354 = vst [vmem:[%s259_s11 + $0x10] sm:$0xf] %v343_v22 }
  0x9d   : > { %352 = vst [vmem:[%s259_s11] sm:$0xff] %v344_v25  ;;  %v347_v26 = vsel %vm341_vm2, %v345_v23, %v346_v24 }
  0x9e   : > { %353 = vst [vmem:[%s259_s11 + $0x8] sm:$0xff] %v347_v26 }
  0x9f   : > { %355 = vst [vmem:[%s259_s11 + $0x18] sm:$0xf] %v346_v24 }
  0xa0 PF: > { %s15_s17 = sadd.s32 1, %s565_s17   ;;  %s654_s15 = smov %s561_s16 }
  0xa1   : > { %p12_p5 = scmp.ge.s32.totalorder %s15_s17, 4   ;;  %s655_s16 = smov %s657_s18 }
  0xa3   :  { %14 = sbr.rel (!%p12_p5) target bundleno = 2 (0x2), region = 74 }

</bundles_post_ra>
